<compile_context>
chip_gen: v7x
topology: tpu7x:2x2x1
jax: 0.10.0
libtpu: 0.0.40
codegen_flags: <defaults>
</compile_context>

<pallas_src>
from functools import partial

import jax
import jax.numpy as jnp
from jax.experimental import pallas as pl
from jax.experimental.pallas import tpu as pltpu


LANE = 128  # lane width / padding target for feature dims


def _round_up(x, m):
    return ((x + m - 1) // m) * m


# ----------------------------------------------------------------------------
# Kernel
# ----------------------------------------------------------------------------
def dqn_kernel(x_ref,
               w1_ref, b1_ref,
               w2_ref, b2_ref,
               w3_ref, b3_ref,
               w4_ref, b4_ref,
               out_ref):
    wdt = w1_ref.dtype  # f32 or bf16; matmuls always accumulate in f32

    x = x_ref[...].astype(wdt)

    # fc1 (+ folded bn1) -> relu
    h = jnp.dot(x, w1_ref[...], preferred_element_type=jnp.float32) + b1_ref[...]
    h = jnp.maximum(h, 0.0)

    # fc2 (+ folded bn2) -> relu
    h = jnp.dot(h.astype(wdt), w2_ref[...],
                preferred_element_type=jnp.float32) + b2_ref[...]
    h = jnp.maximum(h, 0.0)

    # fc3 (+ folded bn3) -> relu
    h = jnp.dot(h.astype(wdt), w3_ref[...],
                preferred_element_type=jnp.float32) + b3_ref[...]
    h = jnp.maximum(h, 0.0)

    # fc4 (output lanes padded to 128 -> unmasked full-lane store)
    out_ref[...] = (jnp.dot(h.astype(wdt), w4_ref[...],
                            preferred_element_type=jnp.float32)
                    + b4_ref[...]).astype(out_ref.dtype)


# ----------------------------------------------------------------------------
# Parameter construction (PyTorch-like init), reference, and fold/pad
# ----------------------------------------------------------------------------
def _linear_params(key, fan_in, fan_out):
    """PyTorch nn.Linear default init (U[-1/sqrt(fan_in), 1/sqrt(fan_in)]);
    weight stored pre-transposed as [in, out]."""
    kw, kb = jax.random.split(key)
    bound = 1.0 / float(fan_in) ** 0.5
    w = jax.random.uniform(kw, (fan_in, fan_out), jnp.float32, -bound, bound)
    b = jax.random.uniform(kb, (1, fan_out), jnp.float32, -bound, bound)
    return w, b


def _bn_params(key, features):
    """Eval-mode BatchNorm1d raw params: (gamma, beta, running_mean, running_var)."""
    kg, kb, km, kv = jax.random.split(key, 4)
    gamma = 1.0 + 0.1 * jax.random.normal(kg, (1, features), jnp.float32)
    beta = 0.1 * jax.random.normal(kb, (1, features), jnp.float32)
    mean = 0.1 * jax.random.normal(km, (1, features), jnp.float32)
    var = 1.0 + 0.1 * jax.random.uniform(kv, (1, features), jnp.float32)
    return gamma, beta, mean, var


def make_dqn_params(key, inputs, outputs, hidden_size=128, eps=1e-5):
    keys = jax.random.split(key, 7)
    w1, b1 = _linear_params(keys[0], inputs, hidden_size)
    bn1 = _bn_params(keys[1], hidden_size)
    w2, b2 = _linear_params(keys[2], hidden_size, 64)
    bn2 = _bn_params(keys[3], 64)
    w3, b3 = _linear_params(keys[4], 64, 32)
    bn3 = _bn_params(keys[5], 32)
    w4, b4 = _linear_params(keys[6], 32, outputs)
    return dict(w1=w1, b1=b1, bn1=bn1,
                w2=w2, b2=b2, bn2=bn2,
                w3=w3, b3=b3, bn3=bn3,
                w4=w4, b4=b4, eps=eps)


def _bn_eval(h, bn, eps):
    gamma, beta, mean, var = bn
    return (h - mean) / jnp.sqrt(var + eps) * gamma + beta


def dqn_reference(x, raw):
    """Pure-JAX reference matching the PyTorch module in eval mode."""
    eps = raw["eps"]
    h = jnp.maximum(_bn_eval(x @ raw["w1"] + raw["b1"], raw["bn1"], eps), 0.0)
    h = jnp.maximum(_bn_eval(h @ raw["w2"] + raw["b2"], raw["bn2"], eps), 0.0)
    h = jnp.maximum(_bn_eval(h @ raw["w3"] + raw["b3"], raw["bn3"], eps), 0.0)
    return h @ raw["w4"] + raw["b4"]


def fold_and_pad_params(raw, weight_dtype=jnp.float32, lane_pad=LANE):
    """Fold BN affine into the preceding linear layer and zero-pad all output
    feature dims up to `lane_pad` lanes.  Padded weight/bias columns are zero,
    so padded lanes are exactly zero through every relu."""
    eps = raw["eps"]

    def fold(w, b, bn):
        gamma, beta, mean, var = bn
        scale = gamma / jnp.sqrt(var + eps)          # (1, out)
        shift = beta - mean * scale                  # (1, out)
        return w * scale, b * scale + shift

    w1, b1 = fold(raw["w1"], raw["b1"], raw["bn1"])
    w2, b2 = fold(raw["w2"], raw["b2"], raw["bn2"])
    w3, b3 = fold(raw["w3"], raw["b3"], raw["bn3"])
    w4, b4 = raw["w4"], raw["b4"]

    def pad_to(a, rows, cols):
        return jnp.pad(a, ((0, rows - a.shape[0]), (0, cols - a.shape[1])))

    h1 = _round_up(w1.shape[1], lane_pad)
    h2 = _round_up(w2.shape[1], lane_pad)
    h3 = _round_up(w3.shape[1], lane_pad)
    op = _round_up(w4.shape[1], lane_pad)

    w1p = pad_to(w1, w1.shape[0], h1)
    b1p = pad_to(b1, 1, h1)
    w2p = pad_to(w2, h1, h2)
    b2p = pad_to(b2, 1, h2)
    w3p = pad_to(w3, h2, h3)
    b3p = pad_to(b3, 1, h3)
    w4p = pad_to(w4, h3, op)
    b4p = pad_to(b4, 1, op)

    cast = lambda a: a.astype(weight_dtype)
    # Biases stay f32 (added after f32-accumulated matmul).
    return (cast(w1p), b1p, cast(w2p), b2p, cast(w3p), b3p, cast(w4p), b4p)


# ----------------------------------------------------------------------------
# Pallas wrapper
# ----------------------------------------------------------------------------
@partial(jax.jit, static_argnames=("outputs", "tile_b"))
def dqn_forward(x, params, *, outputs, tile_b=512):
    """Batch-gridded forward.  `params` is the output of fold_and_pad_params."""
    (w1, b1, w2, b2, w3, b3, w4, b4) = params
    batch, in_dim = x.shape
    out_pad = w4.shape[1]

    # Tile the batch: multiple of 8 (f32 sublane), capped so x/out blocks plus
    # resident weights comfortably fit v7x's 32 MiB default scoped VMEM.
    tb = min(tile_b, _round_up(batch, 8))
    tb = _round_up(tb, 8)
    batch_pad = _round_up(batch, tb)
    xp = jnp.pad(x, ((0, batch_pad - batch), (0, 0)))
    grid = (batch_pad // tb,)

    def resident(p):
        # Constant block index -> weights/biases are DMA'd once and stay in VMEM.
        return pl.BlockSpec(p.shape, lambda i: (0, 0))

    out_padded = pl.pallas_call(
        dqn_kernel,
        out_shape=jax.ShapeDtypeStruct((batch_pad, out_pad), jnp.float32),
        grid=grid,
        in_specs=[pl.BlockSpec((tb, in_dim), lambda i: (i, 0))]
                 + [resident(p) for p in params],
        out_specs=pl.BlockSpec((tb, out_pad), lambda i: (i, 0)),
        compiler_params=pltpu.CompilerParams(
            dimension_semantics=("parallel",),   # megacore split on v7x
        ),
    )(xp, *params)

    return out_padded[:batch, :outputs]


# ----------------------------------------------------------------------------
# Self-test
# ----------------------------------------------------------------------------
if __name__ == "__main__":
    key = jax.random.PRNGKey(0)
    k_x, k_p, k_big = jax.random.split(key, 3)

    batch, inputs, outputs, hidden = 8, 16, 4, 128
    x = jax.random.normal(k_x, (batch, inputs), jnp.float32)
    raw = make_dqn_params(k_p, inputs, outputs, hidden_size=hidden)
    ref = dqn_reference(x, raw)

    # f32 weights: exact-ish match against the unfolded reference.
    params_f32 = fold_and_pad_params(raw, weight_dtype=jnp.float32)
    out = jax.block_until_ready(dqn_forward(x, params_f32, outputs=outputs))
    assert out.shape == (batch, outputs)
    assert jnp.allclose(out, ref, atol=1e-4, rtol=1e-4), "f32 mismatch vs reference"

    # bf16 weights (v6e/v7x HBM-traffic optimization), f32 accumulation.
    params_bf16 = fold_and_pad_params(raw, weight_dtype=jnp.bfloat16)
    out_bf16 = jax.block_until_ready(dqn_forward(x, params_bf16, outputs=outputs))
    assert out_bf16.shape == (batch, outputs)
    assert float(jnp.max(jnp.abs(out_bf16 - ref))) < 0.1, "bf16 path diverged"

    # Non-multiple-of-tile batch: exercises batch padding + grid > 1.
    x_big = jax.random.normal(k_big, (1000, inputs), jnp.float32)
    out_big = jax.block_until_ready(
        dqn_forward(x_big, params_f32, outputs=outputs, tile_b=512))
    ref_big = dqn_reference(x_big, raw)
    assert out_big.shape == (1000, outputs)
    assert jnp.allclose(out_big, ref_big, atol=1e-4, rtol=1e-4), "gridded mismatch"

    print("KERNEL_OK")
</pallas_src>

<mosaic_0001>
module attributes {stable_mosaic.version = 11 : i64} {
  func.func @dqn_kernel(%arg0: i32, %arg1: memref<8x16xf32, #tpu.memory_space<vmem>>, %arg2: memref<16x128xf32, #tpu.memory_space<vmem>>, %arg3: memref<1x128xf32, #tpu.memory_space<vmem>>, %arg4: memref<128x128xf32, #tpu.memory_space<vmem>>, %arg5: memref<1x128xf32, #tpu.memory_space<vmem>>, %arg6: memref<128x128xf32, #tpu.memory_space<vmem>>, %arg7: memref<1x128xf32, #tpu.memory_space<vmem>>, %arg8: memref<128x128xf32, #tpu.memory_space<vmem>>, %arg9: memref<1x128xf32, #tpu.memory_space<vmem>>, %arg10: memref<8x128xf32, #tpu.memory_space<vmem>>) attributes {dimension_semantics = [#tpu.dimension_semantics<parallel>], iteration_bounds = array<i64: 1>, scalar_prefetch = 0 : i64, scratch_operands = 0 : i64, tpu.core_type = #tpu.core_type<tc>, window_params = [{transform_indices = @transform_0, window_bounds = array<i64: 8, 16>}, {pipeline_mode = #tpu.pipeline_mode<synchronous>, transform_indices = @transform_1, window_bounds = array<i64: 16, 128>}, {pipeline_mode = #tpu.pipeline_mode<synchronous>, transform_indices = @transform_2, window_bounds = array<i64: 1, 128>}, {pipeline_mode = #tpu.pipeline_mode<synchronous>, transform_indices = @transform_3, window_bounds = array<i64: 128, 128>}, {pipeline_mode = #tpu.pipeline_mode<synchronous>, transform_indices = @transform_4, window_bounds = array<i64: 1, 128>}, {pipeline_mode = #tpu.pipeline_mode<synchronous>, transform_indices = @transform_5, window_bounds = array<i64: 128, 128>}, {pipeline_mode = #tpu.pipeline_mode<synchronous>, transform_indices = @transform_6, window_bounds = array<i64: 1, 128>}, {pipeline_mode = #tpu.pipeline_mode<synchronous>, transform_indices = @transform_7, window_bounds = array<i64: 128, 128>}, {pipeline_mode = #tpu.pipeline_mode<synchronous>, transform_indices = @transform_8, window_bounds = array<i64: 1, 128>}, {transform_indices = @transform_9, window_bounds = array<i64: 8, 128>}]} {
    %c0 = arith.constant 0 : index
    %c0_0 = arith.constant 0 : index
    %0 = vector.load %arg1[%c0, %c0_0] : memref<8x16xf32, #tpu.memory_space<vmem>>, vector<8x16xf32>
    %c0_1 = arith.constant 0 : index
    %c0_2 = arith.constant 0 : index
    %1 = vector.load %arg2[%c0_1, %c0_2] : memref<16x128xf32, #tpu.memory_space<vmem>>, vector<16x128xf32>
    %cst = arith.constant dense<0.000000e+00> : vector<8x128xf32>
    %2 = tpu.matmul %0, %1, %cst {dimension_numbers = #tpu.dot_dimension_numbers<[1], [0], [0], [1], [0, 0, 1, 1], [], []>} : vector<8x16xf32>, vector<16x128xf32>, vector<8x128xf32> -> vector<8x128xf32>
    %c0_3 = arith.constant 0 : index
    %c0_4 = arith.constant 0 : index
    %3 = vector.load %arg3[%c0_3, %c0_4] : memref<1x128xf32, #tpu.memory_space<vmem>>, vector<1x128xf32>
    %4 = vector.broadcast %3 : vector<1x128xf32> to vector<8x128xf32>
    %5 = arith.addf %2, %4 : vector<8x128xf32>
    %cst_5 = arith.constant 0.000000e+00 : f32
    %6 = vector.broadcast %cst_5 : f32 to vector<8x128xf32>
    %7 = arith.maximumf %5, %6 : vector<8x128xf32>
    %c0_6 = arith.constant 0 : index
    %c0_7 = arith.constant 0 : index
    %8 = vector.load %arg4[%c0_6, %c0_7] : memref<128x128xf32, #tpu.memory_space<vmem>>, vector<128x128xf32>
    %cst_8 = arith.constant dense<0.000000e+00> : vector<8x128xf32>
    %9 = tpu.matmul %7, %8, %cst_8 {dimension_numbers = #tpu.dot_dimension_numbers<[1], [0], [0], [1], [0, 0, 1, 1], [], []>} : vector<8x128xf32>, vector<128x128xf32>, vector<8x128xf32> -> vector<8x128xf32>
    %c0_9 = arith.constant 0 : index
    %c0_10 = arith.constant 0 : index
    %10 = vector.load %arg5[%c0_9, %c0_10] : memref<1x128xf32, #tpu.memory_space<vmem>>, vector<1x128xf32>
    %11 = vector.broadcast %10 : vector<1x128xf32> to vector<8x128xf32>
    %12 = arith.addf %9, %11 : vector<8x128xf32>
    %cst_11 = arith.constant 0.000000e+00 : f32
    %13 = vector.broadcast %cst_11 : f32 to vector<8x128xf32>
    %14 = arith.maximumf %12, %13 : vector<8x128xf32>
    %c0_12 = arith.constant 0 : index
    %c0_13 = arith.constant 0 : index
    %15 = vector.load %arg6[%c0_12, %c0_13] : memref<128x128xf32, #tpu.memory_space<vmem>>, vector<128x128xf32>
    %cst_14 = arith.constant dense<0.000000e+00> : vector<8x128xf32>
    %16 = tpu.matmul %14, %15, %cst_14 {dimension_numbers = #tpu.dot_dimension_numbers<[1], [0], [0], [1], [0, 0, 1, 1], [], []>} : vector<8x128xf32>, vector<128x128xf32>, vector<8x128xf32> -> vector<8x128xf32>
    %c0_15 = arith.constant 0 : index
    %c0_16 = arith.constant 0 : index
    %17 = vector.load %arg7[%c0_15, %c0_16] : memref<1x128xf32, #tpu.memory_space<vmem>>, vector<1x128xf32>
    %18 = vector.broadcast %17 : vector<1x128xf32> to vector<8x128xf32>
    %19 = arith.addf %16, %18 : vector<8x128xf32>
    %cst_17 = arith.constant 0.000000e+00 : f32
    %20 = vector.broadcast %cst_17 : f32 to vector<8x128xf32>
    %21 = arith.maximumf %19, %20 : vector<8x128xf32>
    %c0_18 = arith.constant 0 : index
    %c0_19 = arith.constant 0 : index
    %22 = vector.load %arg8[%c0_18, %c0_19] : memref<128x128xf32, #tpu.memory_space<vmem>>, vector<128x128xf32>
    %cst_20 = arith.constant dense<0.000000e+00> : vector<8x128xf32>
    %23 = tpu.matmul %21, %22, %cst_20 {dimension_numbers = #tpu.dot_dimension_numbers<[1], [0], [0], [1], [0, 0, 1, 1], [], []>} : vector<8x128xf32>, vector<128x128xf32>, vector<8x128xf32> -> vector<8x128xf32>
    %c0_21 = arith.constant 0 : index
    %c0_22 = arith.constant 0 : index
    %24 = vector.load %arg9[%c0_21, %c0_22] : memref<1x128xf32, #tpu.memory_space<vmem>>, vector<1x128xf32>
    %25 = vector.broadcast %24 : vector<1x128xf32> to vector<8x128xf32>
    %26 = arith.addf %23, %25 : vector<8x128xf32>
    %c0_23 = arith.constant 0 : index
    %c0_24 = arith.constant 0 : index
    %27 = vector.load %arg10[%c0_23, %c0_24] : memref<8x128xf32, #tpu.memory_space<vmem>>, vector<8x128xf32>
    tpu.vector_store %arg10[%c0_23, %c0_24], %26 {strides = array<i32>} : memref<8x128xf32, #tpu.memory_space<vmem>>, vector<8x128xf32>,
    return
  }
  func.func @transform_0(%arg0: i32) -> (i32, i32) {
    %c0_i32 = arith.constant 0 : i32
    %c0_i32_0 = arith.constant 0 : i32
    return %arg0, %c0_i32 : i32, i32
  }
  func.func @transform_1(%arg0: i32) -> (i32, i32) {
    %c0_i32 = arith.constant 0 : i32
    %c0_i32_0 = arith.constant 0 : i32
    %c0_i32_1 = arith.constant 0 : i32
    return %c0_i32, %c0_i32_0 : i32, i32
  }
  func.func @transform_2(%arg0: i32) -> (i32, i32) {
    %c0_i32 = arith.constant 0 : i32
    %c0_i32_0 = arith.constant 0 : i32
    %c0_i32_1 = arith.constant 0 : i32
    return %c0_i32, %c0_i32_0 : i32, i32
  }
  func.func @transform_3(%arg0: i32) -> (i32, i32) {
    %c0_i32 = arith.constant 0 : i32
    %c0_i32_0 = arith.constant 0 : i32
    %c0_i32_1 = arith.constant 0 : i32
    return %c0_i32, %c0_i32_0 : i32, i32
  }
  func.func @transform_4(%arg0: i32) -> (i32, i32) {
    %c0_i32 = arith.constant 0 : i32
    %c0_i32_0 = arith.constant 0 : i32
    %c0_i32_1 = arith.constant 0 : i32
    return %c0_i32, %c0_i32_0 : i32, i32
  }
  func.func @transform_5(%arg0: i32) -> (i32, i32) {
    %c0_i32 = arith.constant 0 : i32
    %c0_i32_0 = arith.constant 0 : i32
    %c0_i32_1 = arith.constant 0 : i32
    return %c0_i32, %c0_i32_0 : i32, i32
  }
  func.func @transform_6(%arg0: i32) -> (i32, i32) {
    %c0_i32 = arith.constant 0 : i32
    %c0_i32_0 = arith.constant 0 : i32
    %c0_i32_1 = arith.constant 0 : i32
    return %c0_i32, %c0_i32_0 : i32, i32
  }
  func.func @transform_7(%arg0: i32) -> (i32, i32) {
    %c0_i32 = arith.constant 0 : i32
    %c0_i32_0 = arith.constant 0 : i32
    %c0_i32_1 = arith.constant 0 : i32
    return %c0_i32, %c0_i32_0 : i32, i32
  }
  func.func @transform_8(%arg0: i32) -> (i32, i32) {
    %c0_i32 = arith.constant 0 : i32
    %c0_i32_0 = arith.constant 0 : i32
    %c0_i32_1 = arith.constant 0 : i32
    return %c0_i32, %c0_i32_0 : i32, i32
  }
  func.func @transform_9(%arg0: i32) -> (i32, i32) {
    %c0_i32 = arith.constant 0 : i32
    %c0_i32_0 = arith.constant 0 : i32
    return %arg0, %c0_i32 : i32, i32
  }
}

</mosaic_0001>

<bundles_post_ra>
// kernel: dqn_forward.1
= control target key start
LH: loop header
LB: loop body
LE: loop exit
PB: predicated region body
PF: predicated region fallthrough
CT: control target
= control target key end

     0   :  { %14 = vsyncpa [#allocation3], 0  ;;  %s1024_s0 = inlined_call_operand.hbm [shape: f32[8,16], index: 0, kind: input, shape index: {}]   ;;  %s1025_s1 = inlined_call_operand.hbm [shape: f32[16,128], index: 1, kind: input, shape index: {}]   ;;  %s1026_s2 = inlined_call_operand.vmem [shape: f32[1,128], index: 2, kind: input, shape index: {}]   ;;  %s1027_s3 = inlined_call_operand.hbm [shape: f32[128,128], index: 3, kind: input, shape index: {}]   ;;  %s1028_s4 = inlined_call_operand.vmem [shape: f32[1,128], index: 4, kind: input, shape index: {}]   ;;  %s1029_s5 = inlined_call_operand.hbm [shape: f32[128,128], index: 5, kind: input, shape index: {}]   ;;  %s1030_s6 = inlined_call_operand.vmem [shape: f32[1,128], index: 6, kind: input, shape index: {}]   ;;  %s1031_s7 = inlined_call_operand.hbm [shape: f32[128,128], index: 7, kind: input, shape index: {}]   ;;  %s1032_s8 = inlined_call_operand.vmem [shape: f32[1,128], index: 8, kind: input, shape index: {}]   ;;  %s1033_s9 = inlined_call_operand.vmem [shape: f32[8,128], index: 9, kind: output, shape index: {}]  }
   0x1   :  { %15 = vsyncpa [#allocation5], 0 }
   0x2   :  { %16 = vsyncpa [#allocation8], 0  ;;  %s844_s30 = smov [#allocation4]   ;;  %s728_s13 = scalar_lea.hbm %s1025_s1, 256 }
   0x3   :  { %s32_s10 = sshll.u32 %s844_s30, 4  ;;  %p729_p0 = scmp.ne.s32.totalorder %s1025_s1, %s728_s13  ;;  %s33_s10 = int_to_ptr.vmem [resolvable:$true] %s32_s10 }
   0x4   :  { %p732_p1 = scmp.lt.u32.totalorder %s728_s13, %s1025_s1 }
   0x6   :  { %p734_p2 = pnand %p732_p1, %p729_p0 }
   0x8   :  { %737 = shalt.err (!%p734_p2)
}
   0x9   :  { %s738_s18 = scalar_lea.vmem %s33_s10, 256  ;;  %p743_p4 = scmp.lt.s32.totalorder %s33_s10, %s33_s10 }
   0xa   :  { %p739_p3 = scmp.ne.s32.totalorder %s33_s10, %s738_s18  ;;  %p744_p5 = scmp.lt.s32.totalorder %s738_s18, %s738_s18 }
   0xc   :  { %p745_p6 = por %p744_p5, %p743_p4 }
   0xe   :  { %p746_p7 = pnand %p745_p6, %p739_p3 }
  0x10   :  { %749 = shalt.err (!%p746_p7)
}
  0x11   :  { %s845_s19 = smov 128   ;;  %s846_s20 = smov 8  }
  0x12   :  { %38 = dma.hbm_to_vmem [thread:$0]  %s1025_s1, 256, %s33_s10, [#allocation5], %s845_s19, %s845_s19, %s846_s20  }
  0x13   :  { %s847_s23 = smov [#allocation7]   ;;  %s848_s25 = smov [#allocation2]  }
  0x14   :  { %s60_s24 = sshll.u32 %s847_s23, 4  ;;  %s23_s26 = sshll.u32 %s848_s25, 4  ;;  %s61_s24 = int_to_ptr.vmem [resolvable:$true] %s60_s24  ;;  %s24_s26 = int_to_ptr.vmem [resolvable:$true] %s23_s26 }
  0x15   :  { %s750_s29 = scalar_lea.hbm %s1029_s5, 2048 }
  0x16   :  { %p751_p8 = scmp.ne.s32.totalorder %s1029_s5, %s750_s29  ;;  %p754_p9 = scmp.lt.u32.totalorder %s750_s29, %s1029_s5 }
  0x18   :  { %p756_p10 = pnand %p754_p9, %p751_p8 }
  0x1a   :  { %759 = shalt.err (!%p756_p10)
}
  0x1b   :  { %s760_s1 = scalar_lea.vmem %s61_s24, 2048  ;;  %p765_p12 = scmp.lt.s32.totalorder %s61_s24, %s61_s24 }
  0x1c   :  { %p761_p11 = scmp.ne.s32.totalorder %s61_s24, %s760_s1  ;;  %p766_p13 = scmp.lt.s32.totalorder %s760_s1, %s760_s1 }
  0x1e   :  { %p767_p0 = por %p766_p13, %p765_p12 }
  0x20   :  { %p768_p1 = pnand %p767_p0, %p761_p11 }
  0x22   :  { %771 = shalt.err (!%p768_p1)
}
  0x23   :  { %66 = dma.hbm_to_vmem [thread:$0]  %s1029_s5, 2048, %s61_s24, [#allocation8], %s845_s19, %s845_s19, %s846_s20  }
  0x24   :  { %s772_s17 = scalar_lea.hbm %s1024_s0, 128 }
  0x25   :  { %p773_p2 = scmp.ne.s32.totalorder %s1024_s0, %s772_s17  ;;  %p776_p3 = scmp.lt.u32.totalorder %s772_s17, %s1024_s0 }
  0x27   :  { %p778_p4 = pnand %p776_p3, %p773_p2 }
  0x29   :  { %781 = shalt.err (!%p778_p4)
}
  0x2a   :  { %s782_s25 = scalar_lea.vmem %s24_s26, 128  ;;  %p787_p6 = scmp.lt.s32.totalorder %s24_s26, %s24_s26 }
  0x2b   :  { %p783_p5 = scmp.ne.s32.totalorder %s24_s26, %s782_s25  ;;  %p788_p7 = scmp.lt.s32.totalorder %s782_s25, %s782_s25 }
  0x2d   :  { %p789_p8 = por %p788_p7, %p787_p6 }
  0x2f   :  { %p790_p9 = pnand %p789_p8, %p783_p5 }
  0x31   :  { %793 = shalt.err (!%p790_p9)
}
  0x32   :  { %26 = dma.hbm_to_vmem [thread:$0]  %s1024_s0, 128, %s24_s26, [#allocation3]  }
  0x33   :  { %s849_s27 = smov [#allocation6]   ;;  %s850_s29 = smov [#allocation9]  }
  0x34   :  { %s46_s28 = sshll.u32 %s849_s27, 4  ;;  %s74_s30 = sshll.u32 %s850_s29, 4  ;;  %s47_s28 = int_to_ptr.vmem [resolvable:$true] %s46_s28  ;;  %s75_s30 = int_to_ptr.vmem [resolvable:$true] %s74_s30 }
  0x35   :  { %s794_s13 = scalar_lea.hbm %s1027_s3, 2048 }
  0x36   :  { %p795_p10 = scmp.ne.s32.totalorder %s1027_s3, %s794_s13  ;;  %p798_p11 = scmp.lt.u32.totalorder %s794_s13, %s1027_s3 }
  0x38   :  { %p800_p12 = pnand %p798_p11, %p795_p10 }
  0x3a   :  { %803 = shalt.err (!%p800_p12)
}
  0x3b   :  { %s804_s0 = scalar_lea.vmem %s47_s28, 2048  ;;  %p809_p0 = scmp.lt.s32.totalorder %s47_s28, %s47_s28 }
  0x3c   :  { %p805_p13 = scmp.ne.s32.totalorder %s47_s28, %s804_s0  ;;  %p810_p1 = scmp.lt.s32.totalorder %s804_s0, %s804_s0 }
  0x3e   :  { %p811_p2 = por %p810_p1, %p809_p0 }
  0x40   :  { %p812_p3 = pnand %p811_p2, %p805_p13 }
  0x42   :  { %815 = shalt.err (!%p812_p3)
}
  0x43   :  { %52 = dma.hbm_to_vmem [thread:$0]  %s1027_s3, 2048, %s47_s28, [#allocation5], %s845_s19, %s845_s19, %s846_s20  }
  0x44   :  { %s816_s21 = scalar_lea.hbm %s1031_s7, 2048 }
  0x45   :  { %p817_p4 = scmp.ne.s32.totalorder %s1031_s7, %s816_s21  ;;  %p820_p5 = scmp.lt.u32.totalorder %s816_s21, %s1031_s7 }
  0x47   :  { %p822_p6 = pnand %p820_p5, %p817_p4 }
  0x49   :  { %825 = shalt.err (!%p822_p6)
}
  0x4a   :  { %s826_s24 = scalar_lea.vmem %s75_s30, 2048  ;;  %p831_p8 = scmp.lt.s32.totalorder %s75_s30, %s75_s30 }
  0x4b   :  { %p827_p7 = scmp.ne.s32.totalorder %s75_s30, %s826_s24  ;;  %p832_p9 = scmp.lt.s32.totalorder %s826_s24, %s826_s24 }
  0x4d   :  { %p833_p10 = por %p832_p9, %p831_p8 }
  0x4f   :  { %p834_p11 = pnand %p833_p10, %p827_p7 }
  0x51   :  { %837 = shalt.err (!%p834_p11)
}
  0x52   :  { %80 = dma.hbm_to_vmem [thread:$0]  %s1031_s7, 2048, %s75_s30, [#allocation8], %s845_s19, %s845_s19, %s846_s20  }
  0x53   :  { %838 = dma.done.wait [#allocation3], 128  }
  0x54   :  { %839 = vsyncadd [#allocation3], 4294967168 }
  0x55   :  { %840 = dma.done.wait [#allocation5], 2304  }
  0x56   :  { %841 = vsyncadd [#allocation5], 4294964992 }
  0x57   :  { %842 = dma.done.wait [#allocation8], 4096  }
  0x58   :  { %843 = vsyncadd [#allocation8], 4294963200  ;;  %v851_v0 = vmov 0.0|0.0   ;;  %vm852_vm0 = vmmov 0   ;;  %v853_v1 = vmov 0.0   ;;  %v99_v2 = vld [vmem:[#allocation4] sm:$0xff] }
  0x59   :  { %643 = vmatprep.subr.bf16.mxu0 %v851_v0  ;;  %535 = vmatprep.mubr.msk.f32.mxu0 %vm852_vm0, %v853_v1  ;;  %v100_v3 = vld [vmem:[#allocation4 + $0x8] sm:$0xff]  ;;  %v183_v5 = vld [vmem:[#allocation6] sm:$0xff]  ;;  %v184_v6 = vld [vmem:[#allocation6 + $0x8] sm:$0xff]  ;;  %vm108_vm1 = vcmask 130048  }
  0x5a   :  { %646 = vmatprep.subr.bf16.mxu1 %v851_v0  ;;  %570 = vmatprep.mubr.msk.f32.mxu1 %vm852_vm0, %v853_v1  ;;  %v644_v4 = vpack.c.bf16 %v100_v3, %v99_v2  ;;  %v185_v7 = vld [vmem:[#allocation6 + $0x10] sm:$0xff]  ;;  %v647_v8 = vpack.c.bf16 %v184_v6, %v183_v5  ;;  %v186_v9 = vld [vmem:[#allocation6 + $0x18] sm:$0xff]  ;;  %v98_v10 = vld [vmem:[#allocation2] sm:$0xff] }
  0x5b   :  { %v650_v11 = vpack.c.bf16 %v186_v9, %v185_v7  ;;  %v187_v12 = vld [vmem:[#allocation6 + $0x20] sm:$0xff]  ;;  %v188_v13 = vld [vmem:[#allocation6 + $0x28] sm:$0xff]  ;;  %v189_v15 = vld [vmem:[#allocation6 + $0x30] sm:$0xff] }
  0x5c   :  { %645 = vmatpush3.bf16.msra.mxu0 %v644_v4  ;;  %648 = vmatpush3.bf16.msra.mxu1 %v647_v8  ;;  %v653_v14 = vpack.c.bf16 %v188_v13, %v187_v12  ;;  %v190_v16 = vld [vmem:[#allocation6 + $0x38] sm:$0xff]  ;;  %v191_v18 = vld [vmem:[#allocation6 + $0x40] sm:$0xff]  ;;  %v192_v19 = vld [vmem:[#allocation6 + $0x48] sm:$0xff] }
  0x5d   :  { %670 = vmatprep.subr.bf16.mxu0 %v851_v0  ;;  %649 = vmatprep.subr.bf16.mxu1 %v851_v0  ;;  %v656_v17 = vpack.c.bf16 %v190_v16, %v189_v15  ;;  %v659_v20 = vpack.c.bf16 %v192_v19, %v191_v18  ;;  %v193_v21 = vld [vmem:[#allocation6 + $0x50] sm:$0xff]  ;;  %v194_v22 = vld [vmem:[#allocation6 + $0x58] sm:$0xff]  ;;  %v195_v24 = vld [vmem:[#allocation6 + $0x60] sm:$0xff] }
  0x5e   :  { %v662_v23 = vpack.c.bf16 %v194_v22, %v193_v21  ;;  %v196_v25 = vld [vmem:[#allocation6 + $0x68] sm:$0xff]  ;;  %v197_v27 = vld [vmem:[#allocation6 + $0x70] sm:$0xff]  ;;  %v198_v28 = vld [vmem:[#allocation6 + $0x78] sm:$0xff] }
  0x5f   :  { %536 = vmatmul.mubr.msk.f32.vlgmr.msra.gmra.mrb[0].mxu0 %vm108_vm1, %v98_v10  ;;  %v665_v26 = vpack.c.bf16 %v196_v25, %v195_v24  ;;  %v668_v29 = vpack.c.bf16 %v198_v28, %v197_v27  ;;  %v277_v30 = vld [vmem:[#allocation7] sm:$0xff]  ;;  %v278_v31 = vld [vmem:[#allocation7 + $0x8] sm:$0xff]  ;;  %v279_v32 = vld [vmem:[#allocation7 + $0x10] sm:$0xff] }
  0x60   :  { %605 = vmatprep.mubr.msk.f32.mxu0 %vm852_vm0, %v853_v1  ;;  %651 = vmatpush3.bf16.msra.mxu1 %v650_v11  ;;  %v671_v33 = vpack.c.bf16 %v278_v31, %v277_v30  ;;  %v280_v34 = vld [vmem:[#allocation7 + $0x18] sm:$0xff]  ;;  %v281_v36 = vld [vmem:[#allocation7 + $0x20] sm:$0xff]  ;;  %v282_v37 = vld [vmem:[#allocation7 + $0x28] sm:$0xff] }
  0x61   :  { %652 = vmatprep.subr.bf16.mxu1 %v851_v0  ;;  %v674_v35 = vpack.c.bf16 %v280_v34, %v279_v32  ;;  %v677_v38 = vpack.c.bf16 %v282_v37, %v281_v36  ;;  %v283_v39 = vld [vmem:[#allocation7 + $0x30] sm:$0xff]  ;;  %v284_v40 = vld [vmem:[#allocation7 + $0x38] sm:$0xff]  ;;  %v285_v42 = vld [vmem:[#allocation7 + $0x40] sm:$0xff] }
  0x62   :  { %672 = vmatpush3.bf16.msra.mxu0 %v671_v33  ;;  %v680_v41 = vpack.c.bf16 %v284_v40, %v283_v39  ;;  %v286_v43 = vld [vmem:[#allocation7 + $0x48] sm:$0xff]  ;;  %v287_v45 = vld [vmem:[#allocation7 + $0x50] sm:$0xff]  ;;  %v288_v46 = vld [vmem:[#allocation7 + $0x58] sm:$0xff] }
  0x63   :  { %673 = vmatprep.subr.bf16.mxu0 %v851_v0  ;;  %v683_v44 = vpack.c.bf16 %v286_v43, %v285_v42  ;;  %v686_v47 = vpack.c.bf16 %v288_v46, %v287_v45  ;;  %v289_v48 = vld [vmem:[#allocation7 + $0x60] sm:$0xff]  ;;  %v290_v49 = vld [vmem:[#allocation7 + $0x68] sm:$0xff]  ;;  %v291_v56 = vld [vmem:[#allocation7 + $0x70] sm:$0xff] }
  0x64   :  { %654 = vmatpush3.bf16.msra.mxu1 %v653_v14  ;;  %v689_v50 = vpack.c.bf16 %v290_v49, %v289_v48  ;;  %v472_v51 = vld [vmem:[%s1026_s2] ss:$0 sm:$0xff]  ;;  %v292_v57 = vld [vmem:[#allocation7 + $0x78] sm:$0xff]  ;;  %v371_v59 = vld [vmem:[#allocation9] sm:$0xff] }
  0x65   :  { %655 = vmatprep.subr.bf16.mxu1 %v851_v0  ;;  %v692_v58 = vpack.c.bf16 %v292_v57, %v291_v56  ;;  %v372_v60 = vld [vmem:[#allocation9 + $0x8] sm:$0xff]  ;;  %v373_v61 = vld [vmem:[#allocation9 + $0x10] sm:$0xff]  ;;  %v374_v63 = vld [vmem:[#allocation9 + $0x18] sm:$0xff] }
  0x66   :  { %675 = vmatpush3.bf16.msra.mxu0 %v674_v35  ;;  %v695_v62 = vpack.c.bf16 %v372_v60, %v371_v59  ;;  %v698_v2 = vpack.c.bf16 %v374_v63, %v373_v61  ;;  %v375_v3 = vld [vmem:[#allocation9 + $0x20] sm:$0xff]  ;;  %v376_v4 = vld [vmem:[#allocation9 + $0x28] sm:$0xff]  ;;  %v378_v6 = vld [vmem:[#allocation9 + $0x38] sm:$0xff] }
  0x67   :  { %676 = vmatprep.subr.bf16.mxu0 %v851_v0  ;;  %v701_v5 = vpack.c.bf16 %v376_v4, %v375_v3  ;;  %v379_v8 = vld [vmem:[#allocation9 + $0x40] sm:$0xff]  ;;  %v380_v9 = vld [vmem:[#allocation9 + $0x48] sm:$0xff]  ;;  %v381_v11 = vld [vmem:[#allocation9 + $0x50] sm:$0xff] }
  0x68   :  { %657 = vmatpush3.bf16.msra.mxu1 %v656_v17  ;;  %v707_v10 = vpack.c.bf16 %v380_v9, %v379_v8  ;;  %v382_v12 = vld [vmem:[#allocation9 + $0x58] sm:$0xff]  ;;  %v383_v14 = vld [vmem:[#allocation9 + $0x60] sm:$0xff]  ;;  %v384_v15 = vld [vmem:[#allocation9 + $0x68] sm:$0xff] }
  0x69   :  { %658 = vmatprep.subr.bf16.mxu1 %v851_v0  ;;  %v710_v13 = vpack.c.bf16 %v382_v12, %v381_v11  ;;  %v713_v16 = vpack.c.bf16 %v384_v15, %v383_v14  ;;  %v474_v17 = vld [vmem:[%s1028_s4] ss:$0 sm:$0xff]  ;;  %v385_v22 = vld [vmem:[#allocation9 + $0x70] sm:$0xff] }
  0x6a   :  { %678 = vmatpush3.bf16.msra.mxu0 %v677_v38  ;;  %v475_v25 = vld [vmem:[%s1030_s6] ss:$0 sm:$0xff] }
  0x6b   :  { %679 = vmatprep.subr.bf16.mxu0 %v851_v0 }
  0x6c   :  { %660 = vmatpush3.bf16.msra.mxu1 %v659_v20 }
  0x6d   :  { %661 = vmatprep.subr.bf16.mxu1 %v851_v0 }
  0x6e   :  { %681 = vmatpush3.bf16.msra.mxu0 %v680_v41 }
  0x6f   :  { %682 = vmatprep.subr.bf16.mxu0 %v851_v0 }
  0x70   :  { %663 = vmatpush3.bf16.msra.mxu1 %v662_v23  ;;  %v386_v23 = vld [vmem:[#allocation9 + $0x78] sm:$0xff] }
  0x71   :  { %664 = vmatprep.subr.bf16.mxu1 %v851_v0  ;;  %v716_v24 = vpack.c.bf16 %v386_v23, %v385_v22 }
  0x72   :  { %684 = vmatpush3.bf16.msra.mxu0 %v683_v44 }
  0x73   :  { %685 = vmatprep.subr.bf16.mxu0 %v851_v0 }
  0x74   :  { %666 = vmatpush3.bf16.msra.mxu1 %v665_v26 }
  0x75   :  { %667 = vmatprep.subr.bf16.mxu1 %v851_v0 }
  0x76   :  { %687 = vmatpush3.bf16.msra.mxu0 %v686_v47 }
  0x77   :  { %688 = vmatprep.subr.bf16.mxu0 %v851_v0 }
  0x78   :  { %669 = vmatpush3.bf16.msra.mxu1 %v668_v29  ;;  %v476_v29 = vld [vmem:[%s1032_s8] ss:$0 sm:$0xff] }
  0x79   :  { %694 = vmatprep.subr.bf16.mxu1 %v851_v0 }
  0x7a   :  { %690 = vmatpush3.bf16.msra.mxu0 %v689_v50 }
  0x7b   :  { %691 = vmatprep.subr.bf16.mxu0 %v851_v0 }
  0x7e   :  { %693 = vmatpush3.bf16.msra.mxu0 %v692_v58 }
 0x132   :  { %v178_v52 = vpop.f32.mrb[0].mxu0 }
 0x133   :  { %v179_v53 = vadd.f32 %v472_v51, %v178_v52  ;;  %v537_v54 = vpop.f32.mrb[1].mxu0 }
 0x135   :  { %v182_v55 = vmax.f32 %v179_v53, 0.0 }
 0x137   :  { %571 = vmatmul.mubr.f32.vlgmr.msra.gmra.mrb[0].mxu1 %v182_v55 }
 0x138   :  { %640 = vmatprep.mubr.msk.f32.mxu1 %vm852_vm0, %v853_v1  ;;  %696 = vmatpush3.bf16.msra.mxu1 %v695_v62  ;;  %v377_v1 = vld [vmem:[#allocation9 + $0x30] sm:$0xff] }
 0x139   :  { %697 = vmatprep.subr.bf16.mxu1 %v851_v0  ;;  %v704_v7 = vpack.c.bf16 %v378_v6, %v377_v1 }
 0x13c   :  { %699 = vmatpush3.bf16.msra.mxu1 %v698_v2 }
 0x13d   :  { %700 = vmatprep.subr.bf16.mxu1 %v851_v0 }
 0x140   :  { %702 = vmatpush3.bf16.msra.mxu1 %v701_v5 }
 0x141   :  { %703 = vmatprep.subr.bf16.mxu1 %v851_v0 }
 0x144   :  { %705 = vmatpush3.bf16.msra.mxu1 %v704_v7 }
 0x145   :  { %706 = vmatprep.subr.bf16.mxu1 %v851_v0 }
 0x148   :  { %708 = vmatpush3.bf16.msra.mxu1 %v707_v10 }
 0x149   :  { %709 = vmatprep.subr.bf16.mxu1 %v851_v0 }
 0x14c   :  { %711 = vmatpush3.bf16.msra.mxu1 %v710_v13 }
 0x14d   :  { %712 = vmatprep.subr.bf16.mxu1 %v851_v0 }
 0x150   :  { %714 = vmatpush3.bf16.msra.mxu1 %v713_v16 }
 0x151   :  { %715 = vmatprep.subr.bf16.mxu1 %v851_v0 }
 0x154   :  { %717 = vmatpush3.bf16.msra.mxu1 %v716_v24 }
 0x20a   :  { %v272_v18 = vpop.f32.mrb[0].mxu1 }
 0x20b   :  { %v273_v19 = vadd.f32 %v474_v17, %v272_v18  ;;  %v572_v20 = vpop.f32.mrb[1].mxu1 }
 0x20d   :  { %v276_v21 = vmax.f32 %v273_v19, 0.0 }
 0x20f   :  { %606 = vmatmul.mubr.f32.vlgmr.msra.gmra.mrb[2].mxu0 %v276_v21 }
 0x2e2   :  { %v366_v26 = vpop.f32.mrb[2].mxu0 }
 0x2e3   :  { %v367_v27 = vadd.f32 %v475_v25, %v366_v26  ;;  %v607_v0 = vpop.f32.mrb[3].mxu0 }
 0x2e5   :  { %v370_v28 = vmax.f32 %v367_v27, 0.0 }
 0x2e7   :  { %641 = vmatmul.mubr.f32.vlgmr.msra.gmra.mrb[2].mxu1 %v370_v28 }
 0x3ba   :  { %v460_v30 = vpop.f32.mrb[2].mxu1 }
 0x3bb   :  { %v461_v31 = vadd.f32 %v476_v29, %v460_v30  ;;  %v642_v32 = vpop.f32.mrb[3].mxu1 }
 0x3bd   :  { %464 = vst [vmem:[%s1033_s9] sm:$0xff] %v461_v31 }
 0x3be   :  { %469 = vsyncpa [#allocation3], 1 }
 0x3bf   :  { %470 = vsyncpa [#allocation5], 1 }
 0x3c0   :  { %471 = vsyncpa [#allocation8], 1 }

</bundles_post_ra>
